<compile_context>
chip_gen: v5e
topology: v5e:2x2
jax: 0.10.0
libtpu: 0.0.40
codegen_flags: <defaults>
</compile_context>

<pallas_src>
import functools

import jax
import jax.numpy as jnp
from jax.experimental import pallas as pl
from jax.experimental.pallas import tpu as pltpu

_TARGET_BLOCK_BYTES = 8 * 1024 * 1024    # ~8 MiB per input block
_VMEM_LIMIT_BYTES = 48 * 1024 * 1024     # 2 arrays x 2 buffers x 8 MiB = 32 MiB + headroom


def _swish_kernel(x_ref, o_ref, *, half_beta):
    # sigmoid(beta*x) = 0.5 * tanh((0.5*beta)*x) + 0.5 -> transcendental on EUP slot.
    # f32 compute keeps the path exact and safe on v5e (no bf16 VPU/EUP); cost is
    # negligible since the kernel is HBM-bound.
    x = x_ref[...].astype(jnp.float32)
    sig = 0.5 * jnp.tanh(half_beta * x) + 0.5
    o_ref[...] = (x * sig).astype(o_ref.dtype)


def _round_up(x, m):
    return ((x + m - 1) // m) * m


def _pick_width(n):
    """Lane-dense slab width for a 128-aligned element count (never needs padding)."""
    for w in (4096, 2048, 1024, 512, 256, 128):
        if n % w == 0 and n // w >= 8:
            return w
    for w in (4096, 2048, 1024, 512, 256, 128):
        if n % w == 0:
            return w
    return 128


def _swish_bulk(flat, half_beta, donate):
    """Pallas swish over a flat, 128-aligned array. Returns a flat array."""
    n = flat.shape[0]
    dtype = flat.dtype
    width = _pick_width(n)
    rows = n // width
    slab = flat.reshape(rows, width)          # lane-dense (rows, width)

    itemsize = jnp.dtype(dtype).itemsize
    row_align = 32 if itemsize == 1 else (16 if itemsize == 2 else 8)
    target_rows = max(row_align, _TARGET_BLOCK_BYTES // (width * itemsize))
    target_rows -= target_rows % row_align

    if rows > target_rows:
        block_rows = target_rows
    elif rows >= 2 * row_align:
        # Fits in a single block, but force >=2 programs so both v7x TCs stream.
        block_rows = min(target_rows, _round_up(pl.cdiv(rows, 2), row_align))
    else:
        block_rows = rows                     # tiny tensor: single full-dim block
    grid = (pl.cdiv(rows, block_rows),)       # partial tail block masked by Pallas

    kernel = functools.partial(_swish_kernel, half_beta=half_beta)

    out = pl.pallas_call(
        kernel,
        out_shape=jax.ShapeDtypeStruct((rows, width), dtype),
        grid=grid,
        in_specs=[pl.BlockSpec((block_rows, width), lambda i: (i, 0))],
        out_specs=pl.BlockSpec((block_rows, width), lambda i: (i, 0)),
        input_output_aliases={0: 0} if donate else {},
        compiler_params=pltpu.CompilerParams(
            dimension_semantics=("parallel",),   # shards grid across the 2 TCs on v7x
            vmem_limit_bytes=_VMEM_LIMIT_BYTES,
        ),
    )(slab)
    return out.reshape(-1)


def swish(x, beta=10.0, donate=False):
    """Elementwise x * sigmoid(beta * x), computed in a Pallas TPU kernel."""
    orig_shape = x.shape
    orig_dtype = x.dtype
    half_beta = 0.5 * float(beta)   # closure constant; retraces per distinct beta value

    flat = x.reshape(-1)
    n = flat.shape[0]
    rem = n % 128
    n_bulk = n - rem

    if n_bulk == 0:
        # Fewer than 128 elements: not worth a kernel launch.
        xf = flat.astype(jnp.float32)
        return (xf * jax.nn.sigmoid(float(beta) * xf)).astype(orig_dtype).reshape(orig_shape)

    if rem == 0:
        out_flat = _swish_bulk(flat, half_beta, donate)
    else:
        # 128-aligned bulk through Pallas, tiny (<128 element) remainder in plain jnp.
        # TODO(synk): a fully copy-free arbitrary-n path would take the input with
        # memory_space=pl.ANY and do manual chunked DMA with a bounded final chunk.
        bulk_out = _swish_bulk(flat[:n_bulk], half_beta, donate)
        tail = flat[n_bulk:].astype(jnp.float32)
        tail_out = (tail * jax.nn.sigmoid(float(beta) * tail)).astype(orig_dtype)
        out_flat = jnp.concatenate([bulk_out, tail_out])

    return out_flat.reshape(orig_shape)


if __name__ == "__main__":
    key = jax.random.PRNGKey(0)
    # NCHW input matching the PyTorch conv-style convention: (batch=2, C=4, H=16, W=16)
    x = jax.random.normal(key, (2, 4, 16, 16), dtype=jnp.float32)

    # Module __init__ default: beta = 10, float32 ('single' precision)
    beta = 10.0

    y = jax.block_until_ready(swish(x, beta=beta))

    # Sanity check against plain-JAX reference
    ref = x * jax.nn.sigmoid(beta * x)
    assert y.shape == x.shape and y.dtype == x.dtype
    assert jnp.allclose(y, ref, atol=1e-4, rtol=1e-4), float(jnp.max(jnp.abs(y - ref)))

    print("KERNEL_OK")
</pallas_src>

<mosaic_0001>
module attributes {stable_mosaic.version = 11 : i64} {
  func.func @_swish_kernel(%arg0: i32, %arg1: memref<8x256xf32, #tpu.memory_space<vmem>>, %arg2: memref<8x256xf32, #tpu.memory_space<vmem>>) attributes {dimension_semantics = [#tpu.dimension_semantics<parallel>], iteration_bounds = array<i64: 1>, scalar_prefetch = 0 : i64, scratch_operands = 0 : i64, tpu.core_type = #tpu.core_type<tc>, window_params = [{transform_indices = @transform_0, window_bounds = array<i64: 8, 256>}, {transform_indices = @transform_1, window_bounds = array<i64: 8, 256>}]} {
    %c0 = arith.constant 0 : index
    %c0_0 = arith.constant 0 : index
    %0 = vector.load %arg1[%c0, %c0_0] : memref<8x256xf32, #tpu.memory_space<vmem>>, vector<8x256xf32>
    %cst = arith.constant 5.000000e+00 : f32
    %1 = vector.broadcast %cst : f32 to vector<8x256xf32>
    %2 = arith.mulf %1, %0 : vector<8x256xf32>
    %3 = math.tanh %2 : vector<8x256xf32>
    %cst_1 = arith.constant 5.000000e-01 : f32
    %4 = vector.broadcast %cst_1 : f32 to vector<8x256xf32>
    %5 = arith.mulf %4, %3 : vector<8x256xf32>
    %cst_2 = arith.constant 5.000000e-01 : f32
    %6 = vector.broadcast %cst_2 : f32 to vector<8x256xf32>
    %7 = arith.addf %5, %6 : vector<8x256xf32>
    %8 = arith.mulf %0, %7 : vector<8x256xf32>
    %c0_3 = arith.constant 0 : index
    %c0_4 = arith.constant 0 : index
    %9 = vector.load %arg2[%c0_3, %c0_4] : memref<8x256xf32, #tpu.memory_space<vmem>>, vector<8x256xf32>
    tpu.vector_store %arg2[%c0_3, %c0_4], %8 {strides = array<i32>} : memref<8x256xf32, #tpu.memory_space<vmem>>, vector<8x256xf32>,
    return
  }
  func.func @transform_0(%arg0: i32) -> (i32, i32) {
    %c0_i32 = arith.constant 0 : i32
    %c0_i32_0 = arith.constant 0 : i32
    return %arg0, %c0_i32 : i32, i32
  }
  func.func @transform_1(%arg0: i32) -> (i32, i32) {
    %c0_i32 = arith.constant 0 : i32
    %c0_i32_0 = arith.constant 0 : i32
    return %arg0, %c0_i32 : i32, i32
  }
}

</mosaic_0001>

<bundles_post_ra>
// kernel: tpu_custom_call.1
= control target key start
LH: loop header
LB: loop body
LE: loop exit
PB: predicated region body
PF: predicated region fallthrough
CT: control target
= control target key end

     0   :  { %6 = vsyncpa [#allocation3], 0  ;;  %s130_s0 = inlined_call_operand.hbm [shape: f32[8,256], index: 0, kind: input, shape index: {}]   ;;  %s131_s1 = inlined_call_operand.hbm [shape: f32[8,256], index: 1, kind: output, shape index: {}]  }
   0x1   :  { %7 = vsyncpa [#allocation4], 0  ;;  %s13_s8 = sshll.u32 %s130_s0, 4  ;;  %s112_s9 = smov [#allocation2]   ;;  %s14_s8 = int_to_ptr.hbm [resolvable:$true] %s13_s8 }
   0x2   :  { %s15_s10 = sshll.u32 %s112_s9, 4  ;;  %s16_s10 = int_to_ptr.vmem [resolvable:$true] %s15_s10 }
   0x3   :  { %18 = dma.hbm_to_vmem [thread:$0]  %s14_s8, 256, %s16_s10, [#allocation3]  }
   0x4   :  { %108 = dma.done.wait [#allocation3], 256  }
   0x5   :  { %109 = vsyncadd [#allocation3], 4294967040  ;;  %v23_v0 = vld [vmem:[#allocation2] sm:$0xff]  ;;  %v24_v1 = vld [vmem:[#allocation2 + $0x8] sm:$0xff]  ;;  %s113_s11 = smov [#allocation5]   ;;  %s44_s14 = sshll.u32 %s131_s1, 4  ;;  %s45_s14 = int_to_ptr.hbm [resolvable:$true] %s44_s14 }
   0x6   :  { %v25_v2 = vmul.f32 5.0, %v23_v0  ;;  %v26_v3 = vmul.f32 5.0, %v24_v1  ;;  %s42_s0 = sshll.u32 %s113_s11, 4  ;;  %s43_s0 = int_to_ptr.vmem [resolvable:$true] %s42_s0 }
   0x8   :  { %56 = vtanh.f32 %v25_v2 }
   0x9   :  { %58 = vtanh.f32 %v26_v3 }
   0xe   :  { %v57_v4 = vpop.eup %56 }
   0xf   :  { %v59_v5 = vpop.eup %58  ;;  %v29_v6 = vmul.f32 0.5, %v57_v4 }
  0x10   :  { %v30_v7 = vmul.f32 0.5, %v59_v5 }
  0x11   :  { %v31_v8 = vadd.f32 0.5, %v29_v6 }
  0x12   :  { %v32_v9 = vadd.f32 0.5, %v30_v7 }
  0x13   :  { %v33_v10 = vmul.f32 %v31_v8, %v23_v0 }
  0x14   :  { %v34_v11 = vmul.f32 %v32_v9, %v24_v1 }
  0x15   :  { %35 = vst [vmem:[#allocation5] sm:$0xff] %v33_v10 }
  0x16   :  { %36 = vst [vmem:[#allocation5 + $0x8] sm:$0xff] %v34_v11 }
  0x17   :  { %47 = dma.vmem_to_hbm [thread:$0]  %s43_s0, 256, %s45_s14, [#allocation4]  }
  0x18   :  { %110 = dma.done.wait [#allocation4], 256  }
  0x19   :  { %111 = vsyncadd [#allocation4], 4294967040 }
  0x1a   :  { %52 = vsyncpa [#allocation3], 1 }
  0x1b   :  { %53 = vsyncpa [#allocation4], 1 }

</bundles_post_ra>
